<compile_context>
chip_gen: v5e
topology: v5e:2x2
jax: 0.10.0
libtpu: 0.0.40
codegen_flags: <defaults>
</compile_context>

<pallas_src>
import functools

import jax
import jax.numpy as jnp
from jax.experimental import pallas as pl
from jax.experimental.pallas import tpu as pltpu

_MiB = 1024 * 1024


def _erp_padding_kernel(x_ref, o_ref, *, pad):
    # x_ref: (Bblk, H, W)    o_ref: (Bblk, H + 2*pad, W + 2*pad)
    p = pad
    x = x_ref[...]                                      # one full-tile load
    # Width wrap: [last p cols | image | first p cols] -> (Bblk, H, W + 2p)
    mid = jnp.concatenate([x[:, :, -p:], x, x[:, :, :p]], axis=-1)
    # Height: zero bands top/bottom.  Wrapped columns stay zero in those rows,
    # matching the PyTorch module (it wraps the already zero-padded tensor).
    zrows = jnp.zeros((x.shape[0], p, mid.shape[-1]), dtype=mid.dtype)
    o_ref[...] = jnp.concatenate([zrows, mid, zrows], axis=1)  # single store
    # NOTE: if this kernel ever becomes XLU/VPU bound (tiny lane-sparse
    # blocks), the cheaper form is a center store o_ref[:, p:-p, p:-p] = x
    # plus two narrow wrap-column stores and two zero row-band stores (no
    # lane-shifting concats).  While DMA-bound, one full-tile store wins.


def _padded_tile_bytes(lead, h, w, itemsize):
    """Real VMEM/HBM footprint of a (lead, h, w) block: the last two dims are
    padded to the TPU (sublane, 128-lane) tile (sub-32-bit dtypes pack extra
    rows per sublane)."""
    sublane = 8 * max(1, 4 // itemsize)
    hpad = pl.cdiv(h, sublane) * sublane
    wpad = pl.cdiv(w, 128) * 128
    return lead * hpad * wpad * itemsize


def _vmem_budgets():
    """Return (per-block in+out budget bytes, vmem cap bytes) for this TPU."""
    kind = ""
    try:
        kind = jax.devices()[0].device_kind.lower()
    except Exception:
        pass
    if "v7" in kind:
        budget, cap = 14 * _MiB, 48 * _MiB    # 64 MiB physical VMEM per TC
    elif "v6" in kind:
        budget, cap = 12 * _MiB, 96 * _MiB    # 128 MiB physical
    elif "v5e" in kind or "v5 lite" in kind or "v5lite" in kind:
        budget, cap = 5 * _MiB, 96 * _MiB     # lowest HBM BW, 128 MiB physical
    else:                                     # unknown / older: stay safe
        budget, cap = 4 * _MiB, 32 * _MiB
    try:  # refine the cap from the real chip when the API is available
        info_fn = getattr(pltpu, "get_tpu_info", None)
        if info_fn is not None:
            cap = min(cap, (int(info_fn().vmem_capacity_bytes) * 3) // 4)
    except Exception:
        pass
    return budget, cap


def _pick_batch_block(nc, per_image_bytes, budget_bytes):
    """#images per grid step: largest block within the VMEM budget, then the
    step count is nudged to be even and >= 2 (even split across v7x's two
    TensorCores, keeps double-buffering alive on all generations)."""
    if nc <= 1:
        return 1
    bblk_max = max(1, min(nc, budget_bytes // max(per_image_bytes, 1)))
    steps = max(pl.cdiv(nc, bblk_max), 2)
    if steps % 2 and steps < nc:
        steps += 1
    return max(1, pl.cdiv(nc, steps))


def erp_padding(x, pad):
    """Pallas equivalent of ERP_padding(pad)(x) for NCHW input x."""
    if pad == 0:
        return x
    N, C, H, W = x.shape
    if pad > W:
        raise ValueError(f"ERP padding requires pad <= W (got pad={pad}, W={W}).")
    Ho, Wo = H + 2 * pad, W + 2 * pad
    nc = N * C
    itemsize = jnp.dtype(x.dtype).itemsize

    # Real (lane/sublane-padded) per-image footprint of one input block plus
    # one output block — for small W this is much larger than nominal bytes.
    per_image_vmem = (_padded_tile_bytes(1, H, W, itemsize)
                      + _padded_tile_bytes(1, Ho, Wo, itemsize))
    block_budget, vmem_cap = _vmem_budgets()
    bblk = _pick_batch_block(nc, per_image_vmem, block_budget)
    grid_len = pl.cdiv(nc, bblk)

    # Double-buffered in+out footprint plus in-kernel temporaries/margin.
    block_vmem = bblk * per_image_vmem
    needed = 3 * block_vmem + 4 * _MiB
    if needed > vmem_cap:
        # TODO(synk): add an H grid axis (interior row bands 'arbitrary',
        # batch axis leading/'parallel', full-W blocks) so panoramas too large
        # for whole-image blocks still pipeline instead of failing here.
        raise ValueError(
            f"ERP padding block is {block_vmem / _MiB:.1f} MiB "
            f"(~{needed / _MiB:.1f} MiB with pipelining), exceeding the VMEM "
            f"cap ({vmem_cap / _MiB:.1f} MiB) for this TPU generation; image "
            f"too large for whole-image blocks (H tiling not implemented).")
    vmem_limit = int(min(vmem_cap, max(needed, 16 * _MiB)))

    x3 = x.reshape(nc, H, W)               # merges major dims: layout-free
    kernel = functools.partial(_erp_padding_kernel, pad=pad)
    bytes_accessed = int(nc * per_image_vmem)   # tiled HBM bytes actually moved

    out3 = pl.pallas_call(
        kernel,
        out_shape=jax.ShapeDtypeStruct((nc, Ho, Wo), x.dtype),
        grid=(grid_len,),
        in_specs=[pl.BlockSpec((bblk, H, W), lambda i: (i, 0, 0))],
        out_specs=pl.BlockSpec((bblk, Ho, Wo), lambda i: (i, 0, 0)),
        compiler_params=pltpu.CompilerParams(
            dimension_semantics=("parallel",),
            vmem_limit_bytes=vmem_limit),
        cost_estimate=pl.CostEstimate(
            flops=0, transcendentals=0, bytes_accessed=bytes_accessed),
    )(x3)
    return out3.reshape(N, C, Ho, Wo)      # splits major dim: layout-free


def _erp_padding_ref(x, pad):
    """Pure-JAX reference mirroring the PyTorch forward exactly."""
    if pad == 0:
        return x
    xp = jnp.pad(x, ((0, 0), (0, 0), (pad, pad), (pad, pad)),
                 mode="constant", constant_values=0)
    xp = xp.at[:, :, :, 0:pad].set(xp[:, :, :, -2 * pad:-pad])
    xp = xp.at[:, :, :, -pad:].set(xp[:, :, :, pad:2 * pad])
    return xp


if __name__ == "__main__":
    key = jax.random.PRNGKey(0)
    k1, k2, k3 = jax.random.split(key, 3)

    # Primary test: small NCHW input; nc=8 -> 2 even grid steps of 4 images.
    N, C, H, W, pad = 2, 4, 16, 16, 2
    xa = jax.random.normal(k1, (N, C, H, W), dtype=jnp.float32)
    out = jax.block_until_ready(erp_padding(xa, pad))
    ref = _erp_padding_ref(xa, pad)
    assert out.shape == (N, C, H + 2 * pad, W + 2 * pad), out.shape
    assert jnp.allclose(out, ref), "mismatch vs. reference (case 1)"

    # Rectangular image, odd pad, nc=3 -> cdiv grid with a masked tail block.
    N2, C2, H2, W2, pad2 = 1, 3, 10, 24, 3
    xb = jax.random.normal(k2, (N2, C2, H2, W2), dtype=jnp.float32)
    out2 = jax.block_until_ready(erp_padding(xb, pad2))
    assert jnp.allclose(out2, _erp_padding_ref(xb, pad2)), "mismatch (case 2)"

    # Prime nc=5 -> non-divisible blocking exercised again (tail of 2 of 3).
    N3, C3, H3, W3, pad3 = 1, 5, 12, 20, 2
    xc = jax.random.normal(k3, (N3, C3, H3, W3), dtype=jnp.float32)
    out3 = jax.block_until_ready(erp_padding(xc, pad3))
    assert jnp.allclose(out3, _erp_padding_ref(xc, pad3)), "mismatch (case 3)"

    # pad == 0 identity path.
    out0 = jax.block_until_ready(erp_padding(xa, 0))
    assert jnp.array_equal(out0, xa)

    print("KERNEL_OK")
</pallas_src>

<mosaic_0001>
module attributes {stable_mosaic.version = 11 : i64} {
  func.func @_erp_padding_kernel(%arg0: i32, %arg1: memref<4x16x16xf32, #tpu.memory_space<vmem>>, %arg2: memref<4x20x20xf32, #tpu.memory_space<vmem>>) attributes {dimension_semantics = [#tpu.dimension_semantics<parallel>], iteration_bounds = array<i64: 2>, scalar_prefetch = 0 : i64, scratch_operands = 0 : i64, tpu.core_type = #tpu.core_type<tc>, window_params = [{transform_indices = @transform_0, window_bounds = array<i64: 4, 16, 16>}, {transform_indices = @transform_1, window_bounds = array<i64: 4, 20, 20>}]} {
    %c0 = arith.constant 0 : index
    %c0_0 = arith.constant 0 : index
    %c0_1 = arith.constant 0 : index
    %0 = vector.load %arg1[%c0, %c0_0, %c0_1] : memref<4x16x16xf32, #tpu.memory_space<vmem>>, vector<4x16x16xf32>
    %1 = vector.extract_strided_slice %0 {offsets = [0, 0, 14], sizes = [4, 16, 2], strides = [1, 1, 1]} : vector<4x16x16xf32> to vector<4x16x2xf32>
    %2 = vector.extract_strided_slice %0 {offsets = [0, 0, 0], sizes = [4, 16, 2], strides = [1, 1, 1]} : vector<4x16x16xf32> to vector<4x16x2xf32>
    %3 = tpu.concatenate %1, %0, %2 in 2 : vector<4x16x2xf32>, vector<4x16x16xf32>, vector<4x16x2xf32> -> vector<4x16x20xf32>
    %cst = arith.constant 0.000000e+00 : f32
    %4 = vector.broadcast %cst : f32 to vector<4x2x20xf32>
    %5 = tpu.concatenate %4, %3, %4 in 1 : vector<4x2x20xf32>, vector<4x16x20xf32>, vector<4x2x20xf32> -> vector<4x20x20xf32>
    %c0_2 = arith.constant 0 : index
    %c0_3 = arith.constant 0 : index
    %c0_4 = arith.constant 0 : index
    %6 = vector.load %arg2[%c0_2, %c0_3, %c0_4] : memref<4x20x20xf32, #tpu.memory_space<vmem>>, vector<4x20x20xf32>
    tpu.vector_store %arg2[%c0_2, %c0_3, %c0_4], %5 {strides = array<i32>} : memref<4x20x20xf32, #tpu.memory_space<vmem>>, vector<4x20x20xf32>,
    return
  }
  func.func @transform_0(%arg0: i32) -> (i32, i32, i32) {
    %c0_i32 = arith.constant 0 : i32
    %c0_i32_0 = arith.constant 0 : i32
    %c0_i32_1 = arith.constant 0 : i32
    return %arg0, %c0_i32, %c0_i32_0 : i32, i32, i32
  }
  func.func @transform_1(%arg0: i32) -> (i32, i32, i32) {
    %c0_i32 = arith.constant 0 : i32
    %c0_i32_0 = arith.constant 0 : i32
    %c0_i32_1 = arith.constant 0 : i32
    return %arg0, %c0_i32, %c0_i32_0 : i32, i32, i32
  }
}

</mosaic_0001>

<bundles_post_ra>
// kernel: tpu_custom_call.1
= control target key start
LH: loop header
LB: loop body
LE: loop exit
PB: predicated region body
PF: predicated region fallthrough
CT: control target
= control target key end

     0   :  { %6 = vsyncpa [#allocation3], 0  ;;  %s664_s0 = inlined_call_operand.hbm [shape: f32[8,16,16], index: 0, kind: input, shape index: {}]   ;;  %s665_s1 = inlined_call_operand.vmem [shape: f32[8,20,20], index: 1, kind: output, shape index: {}]  }
   0x1   :  { %8 = vsyncpa [#allocation3 + $0x1], 0  ;;  %s516_s6 = smov 0   ;;  %s518_s7 = smov 0  }
   0x2   :  { %s520_s8 = smov 0   ;;  %s522_s9 = smov 0  }
   0x3 LB: > { %s374_s10 = sadd.s32 4294967295, %s499_s9   ;;  %s536_s11 = sadd.s32 1, %s499_s9   ;;  %s499_s9 = sphi %s522_s9, %s672_s9   ;;  %s495_s8 = sphi %s520_s8, %s671_s8   ;;  %s491_s7 = sphi %s518_s7, %s670_s7   ;;  %s487_s6 = sphi %s516_s6, %s669_s6  }
   0x4   : > { %s18_s12 = ssub.s32 %s499_s9, %s536_s11  ;;  %s21_s13 = sadd.s32 1, %s495_s8 }
   0x5   : > { %p19_p0 = scmp.eq.s32.totalorder %s18_s12, 0  ;;  %p28_p1 = scmp.ne.s32.totalorder %s495_s8, %s491_s7 }
   0x6   : > { %p29_p2 = scmp.eq.s32.totalorder %s499_s9, 0  ;;  %p34_p3 = scmp.ne.s32.totalorder %s491_s7, %s487_s6 }
   0x7   : > { %s546_s14 = scalar_select %p19_p0, %s495_s8, %s21_s13  }
   0x8   : > { %p548_p4 = por %p29_p2, %p28_p1  ;;  %p35_p5 = scmp.eq.s32.totalorder %s374_s10, 0 }
   0x9   : > { %p397_p6 = scmp.lt.s32.totalorder %s499_s9, 2  ;;  %s84_s17 = sand.u32 1, %s495_s8  }
   0xa   : > { %p555_p7 = por %p35_p5, %p34_p3  ;;  %s378_s18 = sshll.u32 %s84_s17, 6 }
   0xb   : > { %s389_s19 = sshll.u32 %s499_s9, 6  ;;  %s88_s23 = scalar_lea.vmem [#allocation2], %s378_s18 }
   0xc   : > { %s94_s22 = scalar_lea.hbm %s664_s0, %s389_s19  ;;  %s97_s24 = sshll.u32 %s88_s23, 4  ;;  %s98_s24 = int_to_ptr.vmem [resolvable:$true] %s97_s24 }
   0xd   : > { %s95_s25 = sshll.u32 %s94_s22, 4  ;;  %p566_p8 = pnand %p397_p6, %p548_p4  ;;  %s96_s25 = int_to_ptr.hbm [resolvable:$true] %s95_s25 }
   0xe   : > { %p382_p9 = scmp.ge.s32.totalorder %s499_s9, 1  ;;  %s85_s27 = scalar_lea.sflag [#allocation3], %s84_s17 }
   0xf   : > { %s435_s28 = sshra.s32 %s96_s25, 4  ;;  %p439_p11 = pneg %p566_p8  ;;  %s436_s28 = int_to_ptr.hbm [resolvable:$true] %s435_s28 }
  0x10   : > { %s437_s29 = scalar_lea.hbm %s436_s28, 64  ;;  %s442_s3 = scalar_lea.hbm %s664_s0, 128 }
  0x11   : > { %p438_p10 = scmp.ne.s32.totalorder %s436_s28, %s437_s29  ;;  %p443_p0 = scmp.lt.s32.totalorder %s436_s28, %s664_s0 }
  0x12   : > { %p444_p1 = scmp.lt.s32.totalorder %s442_s3, %s437_s29 }
  0x13   : > { %p440_p12 = pnand %p439_p11, %p438_p10 }
  0x14   : > { %p445_p2 = por %p444_p1, %p443_p0 }
  0x15   : > { %p441_p13 = pneg %p440_p12 }
  0x17   : > { %p446_p3 = pnand %p445_p2, %p441_p13 }
  0x19   : > { %449 = shalt.err (!%p446_p3)
}
  0x1a   : > { %s501_s6 = smov 128   ;;  %s502_s12 = smov 8  }
  0x1b   : > { %396 = dma.hbm_to_vmem [thread:$0]  (!%p566_p8), %s96_s25, 1024, %s98_s24, %s85_s27, %s501_s6, %s501_s6, %s502_s12  }
  0x1c   : > { %p105_p4 = scmp.lt.s32.totalorder %s499_s9, 3 }
  0x1e   : > { %p106_p5 = pnand %p382_p9, %p105_p4 }
  0x1f   : > { %s111_s13 = sand.u32 (!%p106_p5), 1, %s491_s7  }
  0x20   : > { %109 = sbr.rel (%p106_p5) target bundleno = 218 (0xda), region = 24  ;;  %s383_s15 = sshll.u32 (!%p106_p5), %s111_s13, 6 }
  0x21   : > { %s112_s17 = scalar_lea.sflag (!%p106_p5), [#allocation3], %s111_s13  ;;  %s115_s18 = scalar_lea.vmem (!%p106_p5), [#allocation2], %s383_s15 }
  0x25   : > { %482 = dma.done.wait (%p555_p7), %s112_s17, 1024  }
  0x26   : > { %484 = vsyncadd (%p555_p7), %s112_s17, 4294966272  ;;  %v148_v0 = vld [vmem:[%s115_s18 + $0x20] sm:$0xff]  ;;  %v146_v1 = vld [vmem:[%s115_s18 + $0x10] sm:$0xff]  ;;  %s503_s19 = smov 114   ;;  %s504_s20 = smov 2   ;;  %vm241_vm0 = vcmask 146432  }
  0x27   : > { %v144_v2 = vld [vmem:[%s115_s18] sm:$0xff]  ;;  %168 = vrot.lane.b32.xlu2 %v148_v0, %s503_s19  ;;  %164 = vrot.lane.b32.xlu1 %v146_v1, %s503_s19  ;;  %v149_v3 = vld [vmem:[%s115_s18 + $0x28] sm:$0xff]  ;;  %s505_s16 = smov 18   ;;  %s384_s21 = sshll.u32 %s374_s10, 2  ;;  %vm232_vm1 = vcmask 15360   ;;  %vm258_vm2 = vcmask 1041408  }
  0x28   : > { %160 = vrot.lane.b32.xlu0 %v144_v2, %s503_s19  ;;  %v147_v4 = vld [vmem:[%s115_s18 + $0x18] sm:$0xff]  ;;  %v145_v5 = vld [vmem:[%s115_s18 + $0x8] sm:$0xff]  ;;  %v150_v7 = vld [vmem:[%s115_s18 + $0x30] sm:$0xff]  ;;  %p138_p6 = scmp.lt.s32.totalorder %s384_s21, 7  ;;  %vm294_vm3 = vcmask 158720   ;;  %vm291_vm4 = vcmask 162816  }
  0x29   : > { %v151_v6 = vld [vmem:[%s115_s18 + $0x38] sm:$0xff] }
  0x2a   : > { %s674_s21 = smov (!%p138_p6, %s384_s21), 7 }
  0x2b   : > { %s390_s22 = smul.u32 24, %s674_s21 }
  0x2d   : > { %s601_s23 = scalar_lea.vmem %s665_s1, %s390_s22 }
  0x2f   : > { %170 = vrot.lane.b32.xlu2 %v149_v3, %s503_s19  ;;  %166 = vrot.lane.b32.xlu1 %v147_v4, %s503_s19 }
  0x30   : > { %162 = vrot.lane.b32.xlu0 %v145_v5, %s503_s19 }
  0x37   : > { %174 = vrot.lane.b32.xlu1 %v151_v6, %s503_s19  ;;  %184 = vrot.lane.b32.xlu2 %v144_v2, %s504_s20 }
  0x38   : > { %172 = vrot.lane.b32.xlu0 %v150_v7, %s503_s19 }
  0x3f   : > { %188 = vrot.lane.b32.xlu1 %v146_v1, %s504_s20  ;;  %190 = vrot.lane.b32.xlu2 %v147_v4, %s504_s20 }
  0x40   : > { %186 = vrot.lane.b32.xlu0 %v145_v5, %s504_s20 }
  0x47   : > { %210 = vrot.lane.b32.xlu1 %v145_v5, %s505_s16  ;;  %192 = vrot.lane.b32.xlu2 %v148_v0, %s504_s20 }
  0x48   : > { %208 = vrot.lane.b32.xlu0 %v144_v2, %s505_s16 }
  0x4f   : > { %212 = vrot.lane.b32.xlu1 %v146_v1, %s505_s16  ;;  %214 = vrot.lane.b32.xlu2 %v147_v4, %s505_s16 }
  0x50   : > { %194 = vrot.lane.b32.xlu0 %v149_v3, %s504_s20 }
  0x57   : > { %198 = vrot.lane.b32.xlu1 %v151_v6, %s504_s20  ;;  %216 = vrot.lane.b32.xlu2 %v148_v0, %s505_s16 }
  0x58   : > { %196 = vrot.lane.b32.xlu0 %v150_v7, %s504_s20 }
  0x5f   : > { %220 = vrot.lane.b32.xlu1 %v150_v7, %s505_s16  ;;  %222 = vrot.lane.b32.xlu2 %v151_v6, %s505_s16 }
  0x60   : > { %218 = vrot.lane.b32.xlu0 %v149_v3, %s505_s16 }
  0x81   : > { %v169_v8 = vpop.permute.xlu2 %168 }
  0x89   : > { %v589_v9 = vpop.permute.xlu2 %170 }
  0x91   : > { %v185_v10 = vpop.permute.xlu2 %184 }
  0x99   : > { %v165_v11 = vpop.permute.xlu1 %164  ;;  %v191_v13 = vpop.permute.xlu2 %190 }
  0x9a   : > { %v161_v12 = vpop.permute.xlu0 %160 }
  0x9b   : > { %v233_v26 = vsel %vm232_vm1, %v161_v12, %v185_v10 }
  0xa1   : > { %v167_v14 = vpop.permute.xlu1 %166  ;;  %v193_v16 = vpop.permute.xlu2 %192 }
  0xa2   : > { %v163_v15 = vpop.permute.xlu0 %162  ;;  %v236_v22 = vsel %vm232_vm1, %v167_v14, %v191_v13  ;;  %v237_v38 = vsel %vm232_vm1, %v169_v8, %v193_v16 }
  0xa9   : > { %v175_v17 = vpop.permute.xlu1 %174  ;;  %v215_v21 = vpop.permute.xlu2 %214 }
  0xaa   : > { %v173_v18 = vpop.permute.xlu0 %172  ;;  %v245_v23 = vsel %vm241_vm0, %v236_v22, %v215_v21 }
  0xab   : > { %v263_v27 = vrot.slane %v245_v23, 6 }
  0xad   : > { %v288_v35 = vsel %vm258_vm2, %v263_v27, 0.0 }
  0xae   : > { %298 = vst.msk [vmem:[%s601_s23 + $0x28] sm:$0xf] %vm294_vm3, %v288_v35 }
  0xb1   : > { %v189_v19 = vpop.permute.xlu1 %188  ;;  %v217_v33 = vpop.permute.xlu2 %216 }
  0xb2   : > { %v187_v20 = vpop.permute.xlu0 %186  ;;  %v246_v39 = vsel %vm241_vm0, %v237_v38, %v217_v33  ;;  %v235_v40 = vsel %vm232_vm1, %v165_v11, %v189_v19 }
  0xb3   : > { %v234_v24 = vsel %vm232_vm1, %v163_v15, %v187_v20  ;;  %v265_v44 = vrot.slane %v246_v39, 6 }
  0xb5   : > { %v285_v48 = vsel %vm258_vm2, 0.0, %v265_v44 }
  0xb6   : > { %299 = vst.msk [vmem:[%s601_s23 + $0x30] sm:$0xff] %vm291_vm4, %v285_v48 }
  0xb9   : > { %v211_v25 = vpop.permute.xlu1 %210  ;;  %v223_v52 = vpop.permute.xlu2 %222 }
  0xba   : > { %v243_v28 = vsel %vm241_vm0, %v234_v24, %v211_v25  ;;  %v209_v29 = vpop.permute.xlu0 %208 }
  0xbb   : > { %v260_v30 = vrot.slane %v243_v28, 6  ;;  %v242_v31 = vsel %vm241_vm0, %v233_v26, %v209_v29 }
  0xbc   : > { %v259_v32 = vrot.slane %v242_v31, 6 }
  0xbd   : > { %v287_v34 = vsel %vm258_vm2, %v260_v30, 0.0 }
  0xbe   : > { %295 = vst.msk [vmem:[%s601_s23 + $0x10] sm:$0xf] %vm294_vm3, %v287_v34  ;;  %v261_v36 = vsel %vm258_vm2, %v259_v32, %v260_v30  ;;  %v283_v37 = vsel %vm258_vm2, 0.0, %v259_v32 }
  0xbf   : > { %292 = vst.msk [vmem:[%s601_s23] sm:$0xff] %vm291_vm4, %v283_v37 }
  0xc0   : > { %293 = vst.msk [vmem:[%s601_s23 + $0x8] sm:$0xff] %vm291_vm4, %v261_v36 }
  0xc1   : > { %v213_v41 = vpop.permute.xlu1 %212 }
  0xc2   : > { %v244_v42 = vsel %vm241_vm0, %v235_v40, %v213_v41  ;;  %v195_v43 = vpop.permute.xlu0 %194 }
  0xc3   : > { %v262_v45 = vrot.slane %v244_v42, 6  ;;  %v238_v56 = vsel %vm232_vm1, %v589_v9, %v195_v43 }
  0xc5   : > { %v264_v46 = vsel %vm258_vm2, %v262_v45, %v263_v27  ;;  %v284_v47 = vsel %vm258_vm2, 0.0, %v262_v45 }
  0xc6   : > { %296 = vst.msk [vmem:[%s601_s23 + $0x18] sm:$0xff] %vm291_vm4, %v284_v47 }
  0xc7   : > { %297 = vst.msk [vmem:[%s601_s23 + $0x20] sm:$0xff] %vm291_vm4, %v264_v46 }
  0xc9   : > { %v199_v49 = vpop.permute.xlu1 %198 }
  0xca   : > { %v197_v50 = vpop.permute.xlu0 %196  ;;  %v240_v51 = vsel %vm232_vm1, %v175_v17, %v199_v49 }
  0xcb   : > { %v239_v53 = vsel %vm232_vm1, %v173_v18, %v197_v50  ;;  %v249_v54 = vsel %vm241_vm0, %v240_v51, %v223_v52 }
  0xcc   : > { %v269_v61 = vrot.slane %v249_v54, 6 }
  0xce   : > { %v290_v3 = vsel %vm258_vm2, %v269_v61, 0.0 }
  0xcf   : > { %304 = vst.msk [vmem:[%s601_s23 + $0x58] sm:$0xf] %vm294_vm3, %v290_v3 }
  0xd1   : > { %v221_v55 = vpop.permute.xlu1 %220 }
  0xd2   : > { %v248_v57 = vsel %vm241_vm0, %v239_v53, %v221_v55  ;;  %v219_v58 = vpop.permute.xlu0 %218 }
  0xd3   : > { %v268_v59 = vrot.slane %v248_v57, 6  ;;  %v247_v60 = vsel %vm241_vm0, %v238_v56, %v219_v58 }
  0xd4   : > { %v266_v62 = vrot.slane %v247_v60, 6 }
  0xd5   : > { %v286_v63 = vsel %vm258_vm2, 0.0, %v268_v59  ;;  %v270_v0 = vsel %vm258_vm2, %v268_v59, %v269_v61 }
  0xd6   : > { %302 = vst.msk [vmem:[%s601_s23 + $0x48] sm:$0xff] %vm291_vm4, %v286_v63  ;;  %v267_v1 = vsel %vm258_vm2, %v265_v44, %v266_v62  ;;  %v289_v2 = vsel %vm258_vm2, %v266_v62, 0.0 }
  0xd7   : > { %300 = vst.msk [vmem:[%s601_s23 + $0x38] sm:$0xff] %vm291_vm4, %v267_v1 }
  0xd8   : > { %301 = vst.msk [vmem:[%s601_s23 + $0x40] sm:$0xf] %vm294_vm3, %v289_v2 }
  0xd9   : > { %303 = vst.msk [vmem:[%s601_s23 + $0x50] sm:$0xff] %vm291_vm4, %v270_v0 }
  0xda PF: > { %p11_p7 = scmp.ge.s32.totalorder %s536_s11, 4   ;;  %s669_s6 = smov %s491_s7 }
  0xdb   : > { %s670_s7 = smov %s495_s8  ;;  %s671_s8 = smov %s546_s14 }
  0xdc   : > { %s672_s9 = smov %s536_s11  ;;  %13 = sbr.rel (!%p11_p7) target bundleno = 3 (0x3), region = 64 }
  0xe1   :  { %329 = vsyncpa [#allocation3], 1 }
  0xe2   :  { %331 = vsyncpa [#allocation3 + $0x1], 1 }

</bundles_post_ra>
